<compile_context>
chip_gen: v7x
topology: tpu7x:2x2x1
jax: 0.10.0
libtpu: 0.0.40
codegen_flags: <defaults>
</compile_context>

<pallas_src>
import jax
import jax.numpy as jnp
from jax.experimental import pallas as pl
from jax.experimental.pallas import tpu as pltpu

HIDDEN_DIM = 64


# ----------------------------------------------------------------------------
# Pallas kernel: masked LSTM recurrence, whole sequence in one invocation.
# ----------------------------------------------------------------------------
def lstm_recurrence_kernel(gx_ref, whh_ref, mask_ref, hs_ref):
    """
    gx_ref:   (T, Bp, 4H) f32  precomputed x @ W_ih + (b_ih+b_hh), gates [i,f,o,g]
    whh_ref:  (H, 4H)     f32  W_hh^T, gate order [i,f,o,g]
    mask_ref: (T, Bp, H)  f32  1.0 where t < length[b], else 0.0
    hs_ref:   (T, Bp, H)  f32  masked hidden states (zero for t >= length)
    """
    H = HIDDEN_DIM
    T, Bp, _ = gx_ref.shape

    # Loop-invariant load hoisted out of the recurrence.
    whh = whh_ref[...]                                   # (H, 4H)

    def step(t, carry):
        h_prev, c_prev = carry
        # Only the small recurrent matmul sits on the serial critical path.
        gates = gx_ref[t] + jnp.dot(h_prev, whh,
                                    preferred_element_type=jnp.float32)  # (Bp,4H)

        sig = jax.nn.sigmoid(gates[:, 0:3 * H])          # [i | f | o] in one slab
        g_g = jnp.tanh(gates[:, 3 * H:4 * H])
        i_g = sig[:, 0:H]
        f_g = sig[:, H:2 * H]
        o_g = sig[:, 2 * H:3 * H]

        c_new = f_g * c_prev + i_g * g_g
        h_new = o_g * jnp.tanh(c_new)

        m = mask_ref[t]                                  # (Bp, H) f32, precomputed
        h_out = m * h_new                                # zeroed past length
        hs_ref[t] = h_out                                # lane-dense (Bp, H) store
        h_next = h_prev + m * (h_new - h_prev)           # freeze state past length
        c_next = c_prev + m * (c_new - c_prev)
        return (h_next, c_next)

    h0 = jnp.zeros((Bp, H), jnp.float32)
    c0 = jnp.zeros((Bp, H), jnp.float32)
    jax.lax.fori_loop(0, T, step, (h0, c0),
                      unroll=True if T <= 16 else 8)


def _reorder_gates(w):
    """Permute the 4H gate axis from PyTorch [i, f, g, o] to kernel [i, f, o, g]."""
    H = HIDDEN_DIM
    return jnp.concatenate(
        [w[..., :2 * H], w[..., 3 * H:4 * H], w[..., 2 * H:3 * H]], axis=-1)


def lstm_classifier_forward(combined_btd, lengths, wih_t, whh_t, bias, wcls, bcls):
    """combined_btd: (B, T, Din) f32; lengths: (B,) int32. Returns (B, T, 1)."""
    B, T, Din = combined_btd.shape
    H = HIDDEN_DIM
    Bp = ((B + 7) // 8) * 8                              # sublane-align batch

    # One-time gate-column reorder (PyTorch order -> kernel order).
    wih_r = _reorder_gates(wih_t)
    whh_r = _reorder_gates(whh_t)
    bias_r = _reorder_gates(bias)

    # Hoisted, non-recurrent input projection: one big matmul instead of T small.
    gates_x = (combined_btd.reshape(B * T, Din) @ wih_r + bias_r
               ).reshape(B, T, 4 * H)
    gates_x = jnp.transpose(gates_x, (1, 0, 2))          # (T, B, 4H) time-major
    lengths = lengths.astype(jnp.int32)
    if Bp > B:
        gates_x = jnp.pad(gates_x, ((0, 0), (0, Bp - B), (0, 0)))
        lengths = jnp.pad(lengths, (0, Bp - B))          # padded rows: length 0

    # Validity mask computed ONCE and pre-broadcast (no per-step compare/bcast).
    mask_tb = (jnp.arange(T, dtype=jnp.int32)[:, None]
               < lengths[None, :]).astype(jnp.float32)   # (T, Bp)
    mask_tbh = jnp.broadcast_to(mask_tb[:, :, None], (T, Bp, H))

    hs = pl.pallas_call(
        lstm_recurrence_kernel,
        out_shape=jax.ShapeDtypeStruct((T, Bp, H), jnp.float32),
        in_specs=[pl.BlockSpec(memory_space=pltpu.MemorySpace.VMEM)] * 3,
        out_specs=pl.BlockSpec(memory_space=pltpu.MemorySpace.VMEM),
        compiler_params=pltpu.CompilerParams(vmem_limit_bytes=32 * 1024 * 1024),
    )(gates_x, whh_r, mask_tbh)

    # Classifier hoisted out of the serial loop: one (T*Bp, H) @ (H, 1) matmul.
    preds = hs.reshape(T * Bp, H) @ wcls + bcls          # (T*Bp, 1)
    preds = preds.reshape(T, Bp, 1)[:, :B, :]
    return jnp.transpose(preds, (1, 0, 2))               # (B, T, 1)


# ----------------------------------------------------------------------------
# Glue: parameter init + feature construction (embeddings, concat) — plain JAX
# ----------------------------------------------------------------------------
def init_params(key, vocab_size, num_countries, num_seasons, num_years,
                embedding_dim=100, country_emb_dim=16, season_emb_dim=8,
                year_emb_dim=8, hidden_dim=HIDDEN_DIM):
    ks = jax.random.split(key, 9)

    def nrm(k, shape, scale=0.1):
        return (scale * jax.random.normal(k, shape)).astype(jnp.float32)

    word_emb = nrm(ks[0], (vocab_size, embedding_dim)).at[0].set(0.0)
    country_emb = nrm(ks[1], (num_countries + 1, country_emb_dim)
                      ).at[num_countries].set(0.0)
    season_emb = nrm(ks[2], (num_seasons + 1, season_emb_dim)
                     ).at[num_seasons].set(0.0)
    year_emb = nrm(ks[3], (num_years + 1, year_emb_dim)
                   ).at[num_years].set(0.0)

    input_dim = (embedding_dim + 2 * country_emb_dim + season_emb_dim
                 + year_emb_dim + 1 + 1)
    wih_t = nrm(ks[4], (input_dim, 4 * hidden_dim))      # PyTorch [i,f,g,o] order
    whh_t = nrm(ks[5], (hidden_dim, 4 * hidden_dim))
    bias = nrm(ks[6], (1, 4 * hidden_dim))               # b_ih + b_hh folded
    wcls = nrm(ks[7], (hidden_dim, 1))
    bcls = nrm(ks[8], (1, 1))
    return dict(word_emb=word_emb, country_emb=country_emb,
                season_emb=season_emb, year_emb=year_emb,
                wih_t=wih_t, whh_t=whh_t, bias=bias, wcls=wcls, bcls=bcls)


def build_features(params, token_ids, senders, receivers, seasons, years,
                   game_scores, game_score_deltas):
    # token_ids: [B, T, L] int32, 0 == pad token.
    w = params['word_emb'][token_ids]                    # [B, T, L, E]
    attn = (token_ids != 0).astype(jnp.float32)          # [B, T, L]
    tok_cnt = attn.sum(axis=-1, keepdims=True)           # [B, T, 1]
    msg_emb = w.sum(axis=2) / jnp.maximum(tok_cnt, 1.0)  # masked mean
    msg_emb = jnp.where(tok_cnt > 0, msg_emb, 0.0)       # '[EMPTY]' -> zeros

    s_emb = params['country_emb'][senders]               # [B, T, 16]
    r_emb = params['country_emb'][receivers]             # [B, T, 16]
    se_emb = params['season_emb'][seasons]               # [B, T, 8]
    y_emb = params['year_emb'][years]                    # [B, T, 8]

    combined = jnp.concatenate(
        [msg_emb, s_emb, r_emb, se_emb, y_emb,
         game_scores[..., None], game_score_deltas[..., None]], axis=-1)
    return combined.astype(jnp.float32)                  # [B, T, 150]


def simple_deception_detector_forward(params, token_ids, senders, receivers,
                                      seasons, years, game_scores,
                                      game_score_deltas, lengths):
    combined = build_features(params, token_ids, senders, receivers, seasons,
                              years, game_scores, game_score_deltas)
    return lstm_classifier_forward(
        combined, lengths, params['wih_t'], params['whh_t'], params['bias'],
        params['wcls'], params['bcls'])                  # (B, T, 1)


# Pure-JAX reference of the LSTM+classifier hot path (PyTorch gate order).
def _reference_lstm(params, x_tbd, mask_tb1):
    H = HIDDEN_DIM
    T, B, _ = x_tbd.shape

    def step(carry, inp):
        h, c = carry
        x_t, m_t = inp
        gates = x_t @ params['wih_t'] + h @ params['whh_t'] + params['bias']
        i_g = jax.nn.sigmoid(gates[:, 0:H])
        f_g = jax.nn.sigmoid(gates[:, H:2 * H])
        g_g = jnp.tanh(gates[:, 2 * H:3 * H])
        o_g = jax.nn.sigmoid(gates[:, 3 * H:4 * H])
        c_new = f_g * c + i_g * g_g
        h_new = o_g * jnp.tanh(c_new)
        valid = m_t > 0
        h2 = jnp.where(valid, h_new, h)
        c2 = jnp.where(valid, c_new, c)
        out_h = jnp.where(valid, h_new, 0.0)
        return (h2, c2), out_h @ params['wcls'] + params['bcls']

    init = (jnp.zeros((B, H), jnp.float32), jnp.zeros((B, H), jnp.float32))
    _, outs = jax.lax.scan(step, init, (x_tbd, mask_tb1))
    return jnp.transpose(outs, (1, 0, 2))


if __name__ == "__main__":
    key = jax.random.PRNGKey(0)
    B, T, L = 4, 8, 12
    vocab_size, num_countries, num_seasons, num_years = 50, 7, 2, 5

    kp, kt, ks, kr, kse, ky, kg, kd = jax.random.split(key, 8)
    params = init_params(kp, vocab_size, num_countries, num_seasons, num_years)

    token_ids = jax.random.randint(kt, (B, T, L), 0, vocab_size, dtype=jnp.int32)
    senders = jax.random.randint(ks, (B, T), 0, num_countries, dtype=jnp.int32)
    receivers = jax.random.randint(kr, (B, T), 0, num_countries, dtype=jnp.int32)
    seasons = jax.random.randint(kse, (B, T), 0, num_seasons, dtype=jnp.int32)
    years = jax.random.randint(ky, (B, T), 0, num_years, dtype=jnp.int32)
    game_scores = jax.random.normal(kg, (B, T), dtype=jnp.float32)
    game_score_deltas = jax.random.normal(kd, (B, T), dtype=jnp.float32)
    lengths = jnp.array([T, 5, T, 3], dtype=jnp.int32)   # max(lengths) == T

    fwd = jax.jit(simple_deception_detector_forward)
    out = fwd(params, token_ids, senders, receivers, seasons, years,
              game_scores, game_score_deltas, lengths)
    out = jax.block_until_ready(out)

    # Sanity check against a pure-JAX reference of the same recurrence.
    combined = build_features(params, token_ids, senders, receivers, seasons,
                              years, game_scores, game_score_deltas)
    x_tbd = jnp.transpose(combined, (1, 0, 2))
    mask_tb1 = (jnp.arange(T)[:, None] < lengths[None, :]
                ).astype(jnp.float32)[..., None]
    ref = _reference_lstm(params, x_tbd, mask_tb1)
    assert out.shape == (B, T, 1)
    assert jnp.allclose(out, ref, atol=1e-4, rtol=1e-4)

    print("KERNEL_OK")
</pallas_src>

<mosaic_0001>
module attributes {stable_mosaic.version = 11 : i64} {
  func.func @lstm_recurrence_kernel(%arg0: memref<8x8x256xf32, #tpu.memory_space<vmem>>, %arg1: memref<64x256xf32, #tpu.memory_space<vmem>>, %arg2: memref<8x8x64xf32, #tpu.memory_space<vmem>>, %arg3: memref<8x8x64xf32, #tpu.memory_space<vmem>>) attributes {dimension_semantics = [], scalar_prefetch = 0 : i64, scratch_operands = 0 : i64, tpu.core_type = #tpu.core_type<tc>} {
    %c0 = arith.constant 0 : index
    %c0_0 = arith.constant 0 : index
    %0 = vector.load %arg1[%c0, %c0_0] : memref<64x256xf32, #tpu.memory_space<vmem>>, vector<64x256xf32>
    %cst = arith.constant 0.000000e+00 : f32
    %1 = vector.broadcast %cst : f32 to vector<8x64xf32>
    %cst_1 = arith.constant 0.000000e+00 : f32
    %2 = vector.broadcast %cst_1 : f32 to vector<8x64xf32>
    %c0_i32 = arith.constant 0 : i32
    %3 = arith.index_cast %c0_i32 : i32 to index
    %c0_2 = arith.constant 0 : index
    %c0_3 = arith.constant 0 : index
    %4 = vector.load %arg0[%3, %c0_2, %c0_3] : memref<8x8x256xf32, #tpu.memory_space<vmem>>, vector<1x8x256xf32>
    %5 = vector.shape_cast %4 : vector<1x8x256xf32> to vector<8x256xf32>
    %cst_4 = arith.constant dense<0.000000e+00> : vector<8x256xf32>
    %6 = tpu.matmul %1, %0, %cst_4 {dimension_numbers = #tpu.dot_dimension_numbers<[1], [0], [0], [1], [0, 0, 1, 1], [], []>} : vector<8x64xf32>, vector<64x256xf32>, vector<8x256xf32> -> vector<8x256xf32>
    %7 = arith.addf %5, %6 : vector<8x256xf32>
    %8 = vector.extract_strided_slice %7 {offsets = [0, 0], sizes = [8, 192], strides = [1, 1]} : vector<8x256xf32> to vector<8x192xf32>
    %9 = arith.negf %8 : vector<8x192xf32>
    %10 = math.exp %9 : vector<8x192xf32>
    %cst_5 = arith.constant 1.000000e+00 : f32
    %11 = vector.broadcast %cst_5 : f32 to vector<8x192xf32>
    %12 = arith.addf %11, %10 : vector<8x192xf32>
    %13 = arith.divf %11, %12 : vector<8x192xf32>
    %14 = vector.extract_strided_slice %7 {offsets = [0, 192], sizes = [8, 64], strides = [1, 1]} : vector<8x256xf32> to vector<8x64xf32>
    %15 = math.tanh %14 : vector<8x64xf32>
    %16 = vector.extract_strided_slice %13 {offsets = [0, 0], sizes = [8, 64], strides = [1, 1]} : vector<8x192xf32> to vector<8x64xf32>
    %17 = vector.extract_strided_slice %13 {offsets = [0, 64], sizes = [8, 64], strides = [1, 1]} : vector<8x192xf32> to vector<8x64xf32>
    %18 = vector.extract_strided_slice %13 {offsets = [0, 128], sizes = [8, 64], strides = [1, 1]} : vector<8x192xf32> to vector<8x64xf32>
    %19 = arith.mulf %17, %2 : vector<8x64xf32>
    %20 = arith.mulf %16, %15 : vector<8x64xf32>
    %21 = arith.addf %19, %20 : vector<8x64xf32>
    %22 = math.tanh %21 : vector<8x64xf32>
    %23 = arith.mulf %18, %22 : vector<8x64xf32>
    %24 = arith.index_cast %c0_i32 : i32 to index
    %c0_6 = arith.constant 0 : index
    %c0_7 = arith.constant 0 : index
    %25 = vector.load %arg2[%24, %c0_6, %c0_7] : memref<8x8x64xf32, #tpu.memory_space<vmem>>, vector<1x8x64xf32>
    %26 = vector.shape_cast %25 : vector<1x8x64xf32> to vector<8x64xf32>
    %27 = arith.mulf %26, %23 : vector<8x64xf32>
    %28 = arith.index_cast %c0_i32 : i32 to index
    %c0_8 = arith.constant 0 : index
    %c0_9 = arith.constant 0 : index
    %29 = vector.load %arg3[%28, %c0_8, %c0_9] : memref<8x8x64xf32, #tpu.memory_space<vmem>>, vector<1x8x64xf32>
    %30 = vector.shape_cast %29 : vector<1x8x64xf32> to vector<8x64xf32>
    %31 = vector.shape_cast %27 : vector<8x64xf32> to vector<1x8x64xf32>
    tpu.vector_store %arg3[%28, %c0_8, %c0_9], %31 {strides = array<i32>} : memref<8x8x64xf32, #tpu.memory_space<vmem>>, vector<1x8x64xf32>,
    %32 = arith.subf %23, %1 : vector<8x64xf32>
    %33 = arith.mulf %26, %32 : vector<8x64xf32>
    %34 = arith.addf %1, %33 : vector<8x64xf32>
    %35 = arith.subf %21, %2 : vector<8x64xf32>
    %36 = arith.mulf %26, %35 : vector<8x64xf32>
    %37 = arith.addf %2, %36 : vector<8x64xf32>
    %c1_i32 = arith.constant 1 : i32
    %38 = arith.index_cast %c1_i32 : i32 to index
    %c0_10 = arith.constant 0 : index
    %c0_11 = arith.constant 0 : index
    %39 = vector.load %arg0[%38, %c0_10, %c0_11] : memref<8x8x256xf32, #tpu.memory_space<vmem>>, vector<1x8x256xf32>
    %40 = vector.shape_cast %39 : vector<1x8x256xf32> to vector<8x256xf32>
    %cst_12 = arith.constant dense<0.000000e+00> : vector<8x256xf32>
    %41 = tpu.matmul %34, %0, %cst_12 {dimension_numbers = #tpu.dot_dimension_numbers<[1], [0], [0], [1], [0, 0, 1, 1], [], []>} : vector<8x64xf32>, vector<64x256xf32>, vector<8x256xf32> -> vector<8x256xf32>
    %42 = arith.addf %40, %41 : vector<8x256xf32>
    %43 = vector.extract_strided_slice %42 {offsets = [0, 0], sizes = [8, 192], strides = [1, 1]} : vector<8x256xf32> to vector<8x192xf32>
    %44 = arith.negf %43 : vector<8x192xf32>
    %45 = math.exp %44 : vector<8x192xf32>
    %cst_13 = arith.constant 1.000000e+00 : f32
    %46 = vector.broadcast %cst_13 : f32 to vector<8x192xf32>
    %47 = arith.addf %46, %45 : vector<8x192xf32>
    %48 = arith.divf %46, %47 : vector<8x192xf32>
    %49 = vector.extract_strided_slice %42 {offsets = [0, 192], sizes = [8, 64], strides = [1, 1]} : vector<8x256xf32> to vector<8x64xf32>
    %50 = math.tanh %49 : vector<8x64xf32>
    %51 = vector.extract_strided_slice %48 {offsets = [0, 0], sizes = [8, 64], strides = [1, 1]} : vector<8x192xf32> to vector<8x64xf32>
    %52 = vector.extract_strided_slice %48 {offsets = [0, 64], sizes = [8, 64], strides = [1, 1]} : vector<8x192xf32> to vector<8x64xf32>
    %53 = vector.extract_strided_slice %48 {offsets = [0, 128], sizes = [8, 64], strides = [1, 1]} : vector<8x192xf32> to vector<8x64xf32>
    %54 = arith.mulf %52, %37 : vector<8x64xf32>
    %55 = arith.mulf %51, %50 : vector<8x64xf32>
    %56 = arith.addf %54, %55 : vector<8x64xf32>
    %57 = math.tanh %56 : vector<8x64xf32>
    %58 = arith.mulf %53, %57 : vector<8x64xf32>
    %59 = arith.index_cast %c1_i32 : i32 to index
    %c0_14 = arith.constant 0 : index
    %c0_15 = arith.constant 0 : index
    %60 = vector.load %arg2[%59, %c0_14, %c0_15] : memref<8x8x64xf32, #tpu.memory_space<vmem>>, vector<1x8x64xf32>
    %61 = vector.shape_cast %60 : vector<1x8x64xf32> to vector<8x64xf32>
    %62 = arith.mulf %61, %58 : vector<8x64xf32>
    %63 = arith.index_cast %c1_i32 : i32 to index
    %c0_16 = arith.constant 0 : index
    %c0_17 = arith.constant 0 : index
    %64 = vector.load %arg3[%63, %c0_16, %c0_17] : memref<8x8x64xf32, #tpu.memory_space<vmem>>, vector<1x8x64xf32>
    %65 = vector.shape_cast %64 : vector<1x8x64xf32> to vector<8x64xf32>
    %66 = vector.shape_cast %62 : vector<8x64xf32> to vector<1x8x64xf32>
    tpu.vector_store %arg3[%63, %c0_16, %c0_17], %66 {strides = array<i32>} : memref<8x8x64xf32, #tpu.memory_space<vmem>>, vector<1x8x64xf32>,
    %67 = arith.subf %58, %34 : vector<8x64xf32>
    %68 = arith.mulf %61, %67 : vector<8x64xf32>
    %69 = arith.addf %34, %68 : vector<8x64xf32>
    %70 = arith.subf %56, %37 : vector<8x64xf32>
    %71 = arith.mulf %61, %70 : vector<8x64xf32>
    %72 = arith.addf %37, %71 : vector<8x64xf32>
    %c2_i32 = arith.constant 2 : i32
    %73 = arith.index_cast %c2_i32 : i32 to index
    %c0_18 = arith.constant 0 : index
    %c0_19 = arith.constant 0 : index
    %74 = vector.load %arg0[%73, %c0_18, %c0_19] : memref<8x8x256xf32, #tpu.memory_space<vmem>>, vector<1x8x256xf32>
    %75 = vector.shape_cast %74 : vector<1x8x256xf32> to vector<8x256xf32>
    %cst_20 = arith.constant dense<0.000000e+00> : vector<8x256xf32>
    %76 = tpu.matmul %69, %0, %cst_20 {dimension_numbers = #tpu.dot_dimension_numbers<[1], [0], [0], [1], [0, 0, 1, 1], [], []>} : vector<8x64xf32>, vector<64x256xf32>, vector<8x256xf32> -> vector<8x256xf32>
    %77 = arith.addf %75, %76 : vector<8x256xf32>
    %78 = vector.extract_strided_slice %77 {offsets = [0, 0], sizes = [8, 192], strides = [1, 1]} : vector<8x256xf32> to vector<8x192xf32>
    %79 = arith.negf %78 : vector<8x192xf32>
    %80 = math.exp %79 : vector<8x192xf32>
    %cst_21 = arith.constant 1.000000e+00 : f32
    %81 = vector.broadcast %cst_21 : f32 to vector<8x192xf32>
    %82 = arith.addf %81, %80 : vector<8x192xf32>
    %83 = arith.divf %81, %82 : vector<8x192xf32>
    %84 = vector.extract_strided_slice %77 {offsets = [0, 192], sizes = [8, 64], strides = [1, 1]} : vector<8x256xf32> to vector<8x64xf32>
    %85 = math.tanh %84 : vector<8x64xf32>
    %86 = vector.extract_strided_slice %83 {offsets = [0, 0], sizes = [8, 64], strides = [1, 1]} : vector<8x192xf32> to vector<8x64xf32>
    %87 = vector.extract_strided_slice %83 {offsets = [0, 64], sizes = [8, 64], strides = [1, 1]} : vector<8x192xf32> to vector<8x64xf32>
    %88 = vector.extract_strided_slice %83 {offsets = [0, 128], sizes = [8, 64], strides = [1, 1]} : vector<8x192xf32> to vector<8x64xf32>
    %89 = arith.mulf %87, %72 : vector<8x64xf32>
    %90 = arith.mulf %86, %85 : vector<8x64xf32>
    %91 = arith.addf %89, %90 : vector<8x64xf32>
    %92 = math.tanh %91 : vector<8x64xf32>
    %93 = arith.mulf %88, %92 : vector<8x64xf32>
    %94 = arith.index_cast %c2_i32 : i32 to index
    %c0_22 = arith.constant 0 : index
    %c0_23 = arith.constant 0 : index
    %95 = vector.load %arg2[%94, %c0_22, %c0_23] : memref<8x8x64xf32, #tpu.memory_space<vmem>>, vector<1x8x64xf32>
    %96 = vector.shape_cast %95 : vector<1x8x64xf32> to vector<8x64xf32>
    %97 = arith.mulf %96, %93 : vector<8x64xf32>
    %98 = arith.index_cast %c2_i32 : i32 to index
    %c0_24 = arith.constant 0 : index
    %c0_25 = arith.constant 0 : index
    %99 = vector.load %arg3[%98, %c0_24, %c0_25] : memref<8x8x64xf32, #tpu.memory_space<vmem>>, vector<1x8x64xf32>
    %100 = vector.shape_cast %99 : vector<1x8x64xf32> to vector<8x64xf32>
    %101 = vector.shape_cast %97 : vector<8x64xf32> to vector<1x8x64xf32>
    tpu.vector_store %arg3[%98, %c0_24, %c0_25], %101 {strides = array<i32>} : memref<8x8x64xf32, #tpu.memory_space<vmem>>, vector<1x8x64xf32>,
    %102 = arith.subf %93, %69 : vector<8x64xf32>
    %103 = arith.mulf %96, %102 : vector<8x64xf32>
    %104 = arith.addf %69, %103 : vector<8x64xf32>
    %105 = arith.subf %91, %72 : vector<8x64xf32>
    %106 = arith.mulf %96, %105 : vector<8x64xf32>
    %107 = arith.addf %72, %106 : vector<8x64xf32>
    %c3_i32 = arith.constant 3 : i32
    %108 = arith.index_cast %c3_i32 : i32 to index
    %c0_26 = arith.constant 0 : index
    %c0_27 = arith.constant 0 : index
    %109 = vector.load %arg0[%108, %c0_26, %c0_27] : memref<8x8x256xf32, #tpu.memory_space<vmem>>, vector<1x8x256xf32>
    %110 = vector.shape_cast %109 : vector<1x8x256xf32> to vector<8x256xf32>
    %cst_28 = arith.constant dense<0.000000e+00> : vector<8x256xf32>
    %111 = tpu.matmul %104, %0, %cst_28 {dimension_numbers = #tpu.dot_dimension_numbers<[1], [0], [0], [1], [0, 0, 1, 1], [], []>} : vector<8x64xf32>, vector<64x256xf32>, vector<8x256xf32> -> vector<8x256xf32>
    %112 = arith.addf %110, %111 : vector<8x256xf32>
    %113 = vector.extract_strided_slice %112 {offsets = [0, 0], sizes = [8, 192], strides = [1, 1]} : vector<8x256xf32> to vector<8x192xf32>
    %114 = arith.negf %113 : vector<8x192xf32>
    %115 = math.exp %114 : vector<8x192xf32>
    %cst_29 = arith.constant 1.000000e+00 : f32
    %116 = vector.broadcast %cst_29 : f32 to vector<8x192xf32>
    %117 = arith.addf %116, %115 : vector<8x192xf32>
    %118 = arith.divf %116, %117 : vector<8x192xf32>
    %119 = vector.extract_strided_slice %112 {offsets = [0, 192], sizes = [8, 64], strides = [1, 1]} : vector<8x256xf32> to vector<8x64xf32>
    %120 = math.tanh %119 : vector<8x64xf32>
    %121 = vector.extract_strided_slice %118 {offsets = [0, 0], sizes = [8, 64], strides = [1, 1]} : vector<8x192xf32> to vector<8x64xf32>
    %122 = vector.extract_strided_slice %118 {offsets = [0, 64], sizes = [8, 64], strides = [1, 1]} : vector<8x192xf32> to vector<8x64xf32>
    %123 = vector.extract_strided_slice %118 {offsets = [0, 128], sizes = [8, 64], strides = [1, 1]} : vector<8x192xf32> to vector<8x64xf32>
    %124 = arith.mulf %122, %107 : vector<8x64xf32>
    %125 = arith.mulf %121, %120 : vector<8x64xf32>
    %126 = arith.addf %124, %125 : vector<8x64xf32>
    %127 = math.tanh %126 : vector<8x64xf32>
    %128 = arith.mulf %123, %127 : vector<8x64xf32>
    %129 = arith.index_cast %c3_i32 : i32 to index
    %c0_30 = arith.constant 0 : index
    %c0_31 = arith.constant 0 : index
    %130 = vector.load %arg2[%129, %c0_30, %c0_31] : memref<8x8x64xf32, #tpu.memory_space<vmem>>, vector<1x8x64xf32>
    %131 = vector.shape_cast %130 : vector<1x8x64xf32> to vector<8x64xf32>
    %132 = arith.mulf %131, %128 : vector<8x64xf32>
    %133 = arith.index_cast %c3_i32 : i32 to index
    %c0_32 = arith.constant 0 : index
    %c0_33 = arith.constant 0 : index
    %134 = vector.load %arg3[%133, %c0_32, %c0_33] : memref<8x8x64xf32, #tpu.memory_space<vmem>>, vector<1x8x64xf32>
    %135 = vector.shape_cast %134 : vector<1x8x64xf32> to vector<8x64xf32>
    %136 = vector.shape_cast %132 : vector<8x64xf32> to vector<1x8x64xf32>
    tpu.vector_store %arg3[%133, %c0_32, %c0_33], %136 {strides = array<i32>} : memref<8x8x64xf32, #tpu.memory_space<vmem>>, vector<1x8x64xf32>,
    %137 = arith.subf %128, %104 : vector<8x64xf32>
    %138 = arith.mulf %131, %137 : vector<8x64xf32>
    %139 = arith.addf %104, %138 : vector<8x64xf32>
    %140 = arith.subf %126, %107 : vector<8x64xf32>
    %141 = arith.mulf %131, %140 : vector<8x64xf32>
    %142 = arith.addf %107, %141 : vector<8x64xf32>
    %c4_i32 = arith.constant 4 : i32
    %143 = arith.index_cast %c4_i32 : i32 to index
    %c0_34 = arith.constant 0 : index
    %c0_35 = arith.constant 0 : index
    %144 = vector.load %arg0[%143, %c0_34, %c0_35] : memref<8x8x256xf32, #tpu.memory_space<vmem>>, vector<1x8x256xf32>
    %145 = vector.shape_cast %144 : vector<1x8x256xf32> to vector<8x256xf32>
    %cst_36 = arith.constant dense<0.000000e+00> : vector<8x256xf32>
    %146 = tpu.matmul %139, %0, %cst_36 {dimension_numbers = #tpu.dot_dimension_numbers<[1], [0], [0], [1], [0, 0, 1, 1], [], []>} : vector<8x64xf32>, vector<64x256xf32>, vector<8x256xf32> -> vector<8x256xf32>
    %147 = arith.addf %145, %146 : vector<8x256xf32>
    %148 = vector.extract_strided_slice %147 {offsets = [0, 0], sizes = [8, 192], strides = [1, 1]} : vector<8x256xf32> to vector<8x192xf32>
    %149 = arith.negf %148 : vector<8x192xf32>
    %150 = math.exp %149 : vector<8x192xf32>
    %cst_37 = arith.constant 1.000000e+00 : f32
    %151 = vector.broadcast %cst_37 : f32 to vector<8x192xf32>
    %152 = arith.addf %151, %150 : vector<8x192xf32>
    %153 = arith.divf %151, %152 : vector<8x192xf32>
    %154 = vector.extract_strided_slice %147 {offsets = [0, 192], sizes = [8, 64], strides = [1, 1]} : vector<8x256xf32> to vector<8x64xf32>
    %155 = math.tanh %154 : vector<8x64xf32>
    %156 = vector.extract_strided_slice %153 {offsets = [0, 0], sizes = [8, 64], strides = [1, 1]} : vector<8x192xf32> to vector<8x64xf32>
    %157 = vector.extract_strided_slice %153 {offsets = [0, 64], sizes = [8, 64], strides = [1, 1]} : vector<8x192xf32> to vector<8x64xf32>
    %158 = vector.extract_strided_slice %153 {offsets = [0, 128], sizes = [8, 64], strides = [1, 1]} : vector<8x192xf32> to vector<8x64xf32>
    %159 = arith.mulf %157, %142 : vector<8x64xf32>
    %160 = arith.mulf %156, %155 : vector<8x64xf32>
    %161 = arith.addf %159, %160 : vector<8x64xf32>
    %162 = math.tanh %161 : vector<8x64xf32>
    %163 = arith.mulf %158, %162 : vector<8x64xf32>
    %164 = arith.index_cast %c4_i32 : i32 to index
    %c0_38 = arith.constant 0 : index
    %c0_39 = arith.constant 0 : index
    %165 = vector.load %arg2[%164, %c0_38, %c0_39] : memref<8x8x64xf32, #tpu.memory_space<vmem>>, vector<1x8x64xf32>
    %166 = vector.shape_cast %165 : vector<1x8x64xf32> to vector<8x64xf32>
    %167 = arith.mulf %166, %163 : vector<8x64xf32>
    %168 = arith.index_cast %c4_i32 : i32 to index
    %c0_40 = arith.constant 0 : index
    %c0_41 = arith.constant 0 : index
    %169 = vector.load %arg3[%168, %c0_40, %c0_41] : memref<8x8x64xf32, #tpu.memory_space<vmem>>, vector<1x8x64xf32>
    %170 = vector.shape_cast %169 : vector<1x8x64xf32> to vector<8x64xf32>
    %171 = vector.shape_cast %167 : vector<8x64xf32> to vector<1x8x64xf32>
    tpu.vector_store %arg3[%168, %c0_40, %c0_41], %171 {strides = array<i32>} : memref<8x8x64xf32, #tpu.memory_space<vmem>>, vector<1x8x64xf32>,
    %172 = arith.subf %163, %139 : vector<8x64xf32>
    %173 = arith.mulf %166, %172 : vector<8x64xf32>
    %174 = arith.addf %139, %173 : vector<8x64xf32>
    %175 = arith.subf %161, %142 : vector<8x64xf32>
    %176 = arith.mulf %166, %175 : vector<8x64xf32>
    %177 = arith.addf %142, %176 : vector<8x64xf32>
    %c5_i32 = arith.constant 5 : i32
    %178 = arith.index_cast %c5_i32 : i32 to index
    %c0_42 = arith.constant 0 : index
    %c0_43 = arith.constant 0 : index
    %179 = vector.load %arg0[%178, %c0_42, %c0_43] : memref<8x8x256xf32, #tpu.memory_space<vmem>>, vector<1x8x256xf32>
    %180 = vector.shape_cast %179 : vector<1x8x256xf32> to vector<8x256xf32>
    %cst_44 = arith.constant dense<0.000000e+00> : vector<8x256xf32>
    %181 = tpu.matmul %174, %0, %cst_44 {dimension_numbers = #tpu.dot_dimension_numbers<[1], [0], [0], [1], [0, 0, 1, 1], [], []>} : vector<8x64xf32>, vector<64x256xf32>, vector<8x256xf32> -> vector<8x256xf32>
    %182 = arith.addf %180, %181 : vector<8x256xf32>
    %183 = vector.extract_strided_slice %182 {offsets = [0, 0], sizes = [8, 192], strides = [1, 1]} : vector<8x256xf32> to vector<8x192xf32>
    %184 = arith.negf %183 : vector<8x192xf32>
    %185 = math.exp %184 : vector<8x192xf32>
    %cst_45 = arith.constant 1.000000e+00 : f32
    %186 = vector.broadcast %cst_45 : f32 to vector<8x192xf32>
    %187 = arith.addf %186, %185 : vector<8x192xf32>
    %188 = arith.divf %186, %187 : vector<8x192xf32>
    %189 = vector.extract_strided_slice %182 {offsets = [0, 192], sizes = [8, 64], strides = [1, 1]} : vector<8x256xf32> to vector<8x64xf32>
    %190 = math.tanh %189 : vector<8x64xf32>
    %191 = vector.extract_strided_slice %188 {offsets = [0, 0], sizes = [8, 64], strides = [1, 1]} : vector<8x192xf32> to vector<8x64xf32>
    %192 = vector.extract_strided_slice %188 {offsets = [0, 64], sizes = [8, 64], strides = [1, 1]} : vector<8x192xf32> to vector<8x64xf32>
    %193 = vector.extract_strided_slice %188 {offsets = [0, 128], sizes = [8, 64], strides = [1, 1]} : vector<8x192xf32> to vector<8x64xf32>
    %194 = arith.mulf %192, %177 : vector<8x64xf32>
    %195 = arith.mulf %191, %190 : vector<8x64xf32>
    %196 = arith.addf %194, %195 : vector<8x64xf32>
    %197 = math.tanh %196 : vector<8x64xf32>
    %198 = arith.mulf %193, %197 : vector<8x64xf32>
    %199 = arith.index_cast %c5_i32 : i32 to index
    %c0_46 = arith.constant 0 : index
    %c0_47 = arith.constant 0 : index
    %200 = vector.load %arg2[%199, %c0_46, %c0_47] : memref<8x8x64xf32, #tpu.memory_space<vmem>>, vector<1x8x64xf32>
    %201 = vector.shape_cast %200 : vector<1x8x64xf32> to vector<8x64xf32>
    %202 = arith.mulf %201, %198 : vector<8x64xf32>
    %203 = arith.index_cast %c5_i32 : i32 to index
    %c0_48 = arith.constant 0 : index
    %c0_49 = arith.constant 0 : index
    %204 = vector.load %arg3[%203, %c0_48, %c0_49] : memref<8x8x64xf32, #tpu.memory_space<vmem>>, vector<1x8x64xf32>
    %205 = vector.shape_cast %204 : vector<1x8x64xf32> to vector<8x64xf32>
    %206 = vector.shape_cast %202 : vector<8x64xf32> to vector<1x8x64xf32>
    tpu.vector_store %arg3[%203, %c0_48, %c0_49], %206 {strides = array<i32>} : memref<8x8x64xf32, #tpu.memory_space<vmem>>, vector<1x8x64xf32>,
    %207 = arith.subf %198, %174 : vector<8x64xf32>
    %208 = arith.mulf %201, %207 : vector<8x64xf32>
    %209 = arith.addf %174, %208 : vector<8x64xf32>
    %210 = arith.subf %196, %177 : vector<8x64xf32>
    %211 = arith.mulf %201, %210 : vector<8x64xf32>
    %212 = arith.addf %177, %211 : vector<8x64xf32>
    %c6_i32 = arith.constant 6 : i32
    %213 = arith.index_cast %c6_i32 : i32 to index
    %c0_50 = arith.constant 0 : index
    %c0_51 = arith.constant 0 : index
    %214 = vector.load %arg0[%213, %c0_50, %c0_51] : memref<8x8x256xf32, #tpu.memory_space<vmem>>, vector<1x8x256xf32>
    %215 = vector.shape_cast %214 : vector<1x8x256xf32> to vector<8x256xf32>
    %cst_52 = arith.constant dense<0.000000e+00> : vector<8x256xf32>
    %216 = tpu.matmul %209, %0, %cst_52 {dimension_numbers = #tpu.dot_dimension_numbers<[1], [0], [0], [1], [0, 0, 1, 1], [], []>} : vector<8x64xf32>, vector<64x256xf32>, vector<8x256xf32> -> vector<8x256xf32>
    %217 = arith.addf %215, %216 : vector<8x256xf32>
    %218 = vector.extract_strided_slice %217 {offsets = [0, 0], sizes = [8, 192], strides = [1, 1]} : vector<8x256xf32> to vector<8x192xf32>
    %219 = arith.negf %218 : vector<8x192xf32>
    %220 = math.exp %219 : vector<8x192xf32>
    %cst_53 = arith.constant 1.000000e+00 : f32
    %221 = vector.broadcast %cst_53 : f32 to vector<8x192xf32>
    %222 = arith.addf %221, %220 : vector<8x192xf32>
    %223 = arith.divf %221, %222 : vector<8x192xf32>
    %224 = vector.extract_strided_slice %217 {offsets = [0, 192], sizes = [8, 64], strides = [1, 1]} : vector<8x256xf32> to vector<8x64xf32>
    %225 = math.tanh %224 : vector<8x64xf32>
    %226 = vector.extract_strided_slice %223 {offsets = [0, 0], sizes = [8, 64], strides = [1, 1]} : vector<8x192xf32> to vector<8x64xf32>
    %227 = vector.extract_strided_slice %223 {offsets = [0, 64], sizes = [8, 64], strides = [1, 1]} : vector<8x192xf32> to vector<8x64xf32>
    %228 = vector.extract_strided_slice %223 {offsets = [0, 128], sizes = [8, 64], strides = [1, 1]} : vector<8x192xf32> to vector<8x64xf32>
    %229 = arith.mulf %227, %212 : vector<8x64xf32>
    %230 = arith.mulf %226, %225 : vector<8x64xf32>
    %231 = arith.addf %229, %230 : vector<8x64xf32>
    %232 = math.tanh %231 : vector<8x64xf32>
    %233 = arith.mulf %228, %232 : vector<8x64xf32>
    %234 = arith.index_cast %c6_i32 : i32 to index
    %c0_54 = arith.constant 0 : index
    %c0_55 = arith.constant 0 : index
    %235 = vector.load %arg2[%234, %c0_54, %c0_55] : memref<8x8x64xf32, #tpu.memory_space<vmem>>, vector<1x8x64xf32>
    %236 = vector.shape_cast %235 : vector<1x8x64xf32> to vector<8x64xf32>
    %237 = arith.mulf %236, %233 : vector<8x64xf32>
    %238 = arith.index_cast %c6_i32 : i32 to index
    %c0_56 = arith.constant 0 : index
    %c0_57 = arith.constant 0 : index
    %239 = vector.load %arg3[%238, %c0_56, %c0_57] : memref<8x8x64xf32, #tpu.memory_space<vmem>>, vector<1x8x64xf32>
    %240 = vector.shape_cast %239 : vector<1x8x64xf32> to vector<8x64xf32>
    %241 = vector.shape_cast %237 : vector<8x64xf32> to vector<1x8x64xf32>
    tpu.vector_store %arg3[%238, %c0_56, %c0_57], %241 {strides = array<i32>} : memref<8x8x64xf32, #tpu.memory_space<vmem>>, vector<1x8x64xf32>,
    %242 = arith.subf %233, %209 : vector<8x64xf32>
    %243 = arith.mulf %236, %242 : vector<8x64xf32>
    %244 = arith.addf %209, %243 : vector<8x64xf32>
    %245 = arith.subf %231, %212 : vector<8x64xf32>
    %246 = arith.mulf %236, %245 : vector<8x64xf32>
    %247 = arith.addf %212, %246 : vector<8x64xf32>
    %c7_i32 = arith.constant 7 : i32
    %248 = arith.index_cast %c7_i32 : i32 to index
    %c0_58 = arith.constant 0 : index
    %c0_59 = arith.constant 0 : index
    %249 = vector.load %arg0[%248, %c0_58, %c0_59] : memref<8x8x256xf32, #tpu.memory_space<vmem>>, vector<1x8x256xf32>
    %250 = vector.shape_cast %249 : vector<1x8x256xf32> to vector<8x256xf32>
    %cst_60 = arith.constant dense<0.000000e+00> : vector<8x256xf32>
    %251 = tpu.matmul %244, %0, %cst_60 {dimension_numbers = #tpu.dot_dimension_numbers<[1], [0], [0], [1], [0, 0, 1, 1], [], []>} : vector<8x64xf32>, vector<64x256xf32>, vector<8x256xf32> -> vector<8x256xf32>
    %252 = arith.addf %250, %251 : vector<8x256xf32>
    %253 = vector.extract_strided_slice %252 {offsets = [0, 0], sizes = [8, 192], strides = [1, 1]} : vector<8x256xf32> to vector<8x192xf32>
    %254 = arith.negf %253 : vector<8x192xf32>
    %255 = math.exp %254 : vector<8x192xf32>
    %cst_61 = arith.constant 1.000000e+00 : f32
    %256 = vector.broadcast %cst_61 : f32 to vector<8x192xf32>
    %257 = arith.addf %256, %255 : vector<8x192xf32>
    %258 = arith.divf %256, %257 : vector<8x192xf32>
    %259 = vector.extract_strided_slice %252 {offsets = [0, 192], sizes = [8, 64], strides = [1, 1]} : vector<8x256xf32> to vector<8x64xf32>
    %260 = math.tanh %259 : vector<8x64xf32>
    %261 = vector.extract_strided_slice %258 {offsets = [0, 0], sizes = [8, 64], strides = [1, 1]} : vector<8x192xf32> to vector<8x64xf32>
    %262 = vector.extract_strided_slice %258 {offsets = [0, 64], sizes = [8, 64], strides = [1, 1]} : vector<8x192xf32> to vector<8x64xf32>
    %263 = vector.extract_strided_slice %258 {offsets = [0, 128], sizes = [8, 64], strides = [1, 1]} : vector<8x192xf32> to vector<8x64xf32>
    %264 = arith.mulf %262, %247 : vector<8x64xf32>
    %265 = arith.mulf %261, %260 : vector<8x64xf32>
    %266 = arith.addf %264, %265 : vector<8x64xf32>
    %267 = math.tanh %266 : vector<8x64xf32>
    %268 = arith.mulf %263, %267 : vector<8x64xf32>
    %269 = arith.index_cast %c7_i32 : i32 to index
    %c0_62 = arith.constant 0 : index
    %c0_63 = arith.constant 0 : index
    %270 = vector.load %arg2[%269, %c0_62, %c0_63] : memref<8x8x64xf32, #tpu.memory_space<vmem>>, vector<1x8x64xf32>
    %271 = vector.shape_cast %270 : vector<1x8x64xf32> to vector<8x64xf32>
    %272 = arith.mulf %271, %268 : vector<8x64xf32>
    %273 = arith.index_cast %c7_i32 : i32 to index
    %c0_64 = arith.constant 0 : index
    %c0_65 = arith.constant 0 : index
    %274 = vector.load %arg3[%273, %c0_64, %c0_65] : memref<8x8x64xf32, #tpu.memory_space<vmem>>, vector<1x8x64xf32>
    %275 = vector.shape_cast %274 : vector<1x8x64xf32> to vector<8x64xf32>
    %276 = vector.shape_cast %272 : vector<8x64xf32> to vector<1x8x64xf32>
    tpu.vector_store %arg3[%273, %c0_64, %c0_65], %276 {strides = array<i32>} : memref<8x8x64xf32, #tpu.memory_space<vmem>>, vector<1x8x64xf32>,
    %277 = arith.subf %268, %244 : vector<8x64xf32>
    %278 = arith.mulf %271, %277 : vector<8x64xf32>
    %279 = arith.addf %244, %278 : vector<8x64xf32>
    %280 = arith.subf %266, %247 : vector<8x64xf32>
    %281 = arith.mulf %271, %280 : vector<8x64xf32>
    %282 = arith.addf %247, %281 : vector<8x64xf32>
    %c8_i32 = arith.constant 8 : i32
    return
  }
}

</mosaic_0001>

<bundles_post_ra>
// kernel: simple_deception_detector_forward.1
= control target key start
LH: loop header
LB: loop body
LE: loop exit
PB: predicated region body
PF: predicated region fallthrough
CT: control target
= control target key end

     0   :  { %v1316_v3 = vmov 0.0   ;;  %s1317_s18 = smov 64   ;;  %vm32_vm0 = vcmask 523264   ;;  %s1624_s1 = inlined_call_operand.vmem [shape: f32[64,256], index: 1, kind: input, shape index: {}]   ;;  %s1625_s0 = inlined_call_operand.vmem [shape: f32[8,8,256], index: 0, kind: input, shape index: {}]   ;;  %s1626_s2 = inlined_call_operand.vmem [shape: f32[8,8,64], index: 2, kind: input, shape index: {}]   ;;  %s1627_s3 = inlined_call_operand.vmem [shape: f32[8,8,64], index: 3, kind: output, shape index: {}]  }
   0x1   :  { %v15_v0 = vld [vmem:[%s1624_s1 + $0x8] sm:$0xff]  ;;  %v17_v1 = vld [vmem:[%s1624_s1 + $0x18] sm:$0xff]  ;;  %v14_v2 = vld [vmem:[%s1624_s1] sm:$0xff]  ;;  %100 = vmatprep.mubr.f32.mxu0 %v1316_v3  ;;  %219 = vmatprep.mubr.f32.mxu1 %v1316_v3 }
   0x2   :  { %v1349_v4 = vpack.c.bf16 %v17_v1, %v15_v0  ;;  %v16_v5 = vld [vmem:[%s1624_s1 + $0x10] sm:$0xff]  ;;  %v19_v6 = vld [vmem:[%s1624_s1 + $0x28] sm:$0xff]  ;;  %v21_v7 = vld [vmem:[%s1624_s1 + $0x38] sm:$0xff] }
   0x3   :  { %v1360_v8 = vpack.c.bf16 %v16_v5, %v14_v2  ;;  %v1362_v9 = vpack.c.bf16 %v21_v7, %v19_v6  ;;  %v18_v10 = vld [vmem:[%s1624_s1 + $0x20] sm:$0xff]  ;;  %v20_v11 = vld [vmem:[%s1624_s1 + $0x30] sm:$0xff]  ;;  %v23_v12 = vld [vmem:[%s1624_s1 + $0x48] sm:$0xff] }
   0x4   :  { %1091 = vmatprep.subr.bf16.mxu0 %v1349_v4  ;;  %v25_v13 = vld [vmem:[%s1624_s1 + $0x58] sm:$0xff]  ;;  %1107 = vmatprep.subr.bf16.mxu1 %v1349_v4  ;;  %v1379_v14 = vpack.c.bf16 %v20_v11, %v18_v10  ;;  %v22_v16 = vld [vmem:[%s1624_s1 + $0x40] sm:$0xff]  ;;  %v24_v17 = vld [vmem:[%s1624_s1 + $0x50] sm:$0xff] }
   0x5   :  { %1093 = vmatpush1.bf16.msra.mxu0 %v1360_v8  ;;  %1109 = vmatpush1.bf16.msra.mxu1 %v1360_v8  ;;  %v1383_v15 = vpack.c.bf16 %v25_v13, %v23_v12  ;;  %v27_v18 = vld [vmem:[%s1624_s1 + $0x68] sm:$0xff]  ;;  %v29_v19 = vld [vmem:[%s1624_s1 + $0x78] sm:$0xff]  ;;  %v1399_v20 = vpack.c.bf16 %v24_v17, %v22_v16  ;;  %v26_v22 = vld [vmem:[%s1624_s1 + $0x60] sm:$0xff] }
   0x6   :  { %1095 = vmatprep.subr.bf16.mxu0 %v1362_v9  ;;  %1111 = vmatprep.subr.bf16.mxu1 %v1362_v9  ;;  %v1403_v21 = vpack.c.bf16 %v29_v19, %v27_v18  ;;  %v28_v23 = vld [vmem:[%s1624_s1 + $0x70] sm:$0xff]  ;;  %v31_v25 = vld [vmem:[%s1625_s0 + $0x8] sm:$0xff]  ;;  %v30_v30 = vld [vmem:[%s1625_s0] sm:$0xff] }
   0x7   :  { %v1413_v24 = vpack.c.bf16 %v28_v23, %v26_v22  ;;  %v139_v47 = vld [vmem:[%s1626_s2] sm:$0xff]  ;;  %v1042_v52 = vld [vmem:[%s1625_s0 + $0x18] sm:$0xff]  ;;  %v1041_v57 = vld [vmem:[%s1625_s0 + $0x10] sm:$0xff] }
   0x8   :  { %v1046_v16 = vld [vmem:[%s1626_s2 + $0x8] sm:$0xff] }
   0x9   :  { %1097 = vmatpush1.bf16.msra.mxu0 %v1379_v14  ;;  %1113 = vmatpush1.bf16.msra.mxu1 %v1379_v14 }
   0xa   :  { %1099 = vmatprep.subr.bf16.mxu0 %v1383_v15  ;;  %1115 = vmatprep.subr.bf16.mxu1 %v1383_v15 }
   0xd   :  { %1101 = vmatpush1.bf16.msra.mxu0 %v1399_v20  ;;  %1117 = vmatpush1.bf16.msra.mxu1 %v1399_v20 }
   0xe   :  { %1103 = vmatprep.subr.bf16.mxu0 %v1403_v21  ;;  %1119 = vmatprep.subr.bf16.mxu1 %v1403_v21 }
  0x11   :  { %1105 = vmatpush1.bf16.msra.mxu0 %v1413_v24  ;;  %1121 = vmatpush1.bf16.msra.mxu1 %v1413_v24 }
  0x12   :  { %1123 = vmatprep.subr.bf16.mxu0 %v1349_v4  ;;  %1139 = vmatprep.subr.bf16.mxu1 %v1349_v4 }
  0x14   :  { %101 = vmatmul.mubr.f32.vlgmr.msra.gmra.mrb[0].mxu0 %v1316_v3 }
  0x15   :  { %1125 = vmatpush1.bf16.msra.mxu0 %v1360_v8  ;;  %347 = vmatprep.mubr.f32.mxu0 %v1316_v3 }
  0x16   :  { %1127 = vmatprep.subr.bf16.mxu0 %v1362_v9 }
  0x19   :  { %1129 = vmatpush1.bf16.msra.mxu0 %v1379_v14 }
  0x1a   :  { %1131 = vmatprep.subr.bf16.mxu0 %v1383_v15 }
  0x1d   :  { %1133 = vmatpush1.bf16.msra.mxu0 %v1399_v20 }
  0x1e   :  { %1135 = vmatprep.subr.bf16.mxu0 %v1403_v21 }
  0x21   :  { %1137 = vmatpush1.bf16.msra.mxu0 %v1413_v24 }
  0x22   :  { %1155 = vmatprep.subr.bf16.mxu0 %v1349_v4 }
  0xe7   :  { %v102_v26 = vpop.f32.mrb[0].mxu0 }
  0xe8   :  { %v104_v27 = vpop.f32.mrb[1].mxu0  ;;  %v107_v31 = vadd.f32 %v102_v26, %v30_v30  ;;  %v1049_v30 = vld [vmem:[%s1625_s0 + $0x28] sm:$0xff] }
  0xe9   :  { %v108_v28 = vadd.f32 %v104_v27, %v31_v25 }
  0xea   :  { %v1039_v32 = vmul.f32 -1.442695, %v107_v31 }
  0xeb   :  { %1220 = vtanh.f32 %v108_v28  ;;  %v1040_v42 = vmul.f32 -1.442695, %v108_v28 }
  0xec   :  { %1222 = vpow2.f32 %v1039_v32 }
  0xf5   :  { %v1221_v29 = vpop.eup %1220 }
  0xf6   :  { %124 = vrot.lane.b32.xlu0 %v1221_v29, %s1317_s18  ;;  %v1223_v33 = vpop.eup %1222 }
  0xf7   :  { %v115_v34 = vadd.f32 1.0, %v1223_v33 }
  0xf9   :  { %1224 = vrcp.f32 %v115_v34 }
 0x103   :  { %v1225_v35 = vpop.eup %1224 }
 0x104   :  { %v122_v38 = vmul.f32 0.0, %v1225_v35 }
 0x168   :  { %v125_v36 = vpop.permute.xlu0 %124 }
 0x169   :  { %v127_v37 = vmul.f32 %v1225_v35, %v125_v36  ;;  %v1048_v35 = vld [vmem:[%s1625_s0 + $0x20] sm:$0xff] }
 0x16b   :  { %129 = vrot.lane.b32.xlu0 %v127_v37, %s1317_s18 }
 0x1dd   :  { %v130_v39 = vpop.permute.xlu0 %129 }
 0x1de   :  { %v132_v40 = vadd.f32 %v130_v39, %v122_v38 }
 0x1e0   :  { %1226 = vtanh.f32 %v132_v40 }
 0x1e1   :  { %1228 = vpow2.f32 %v1040_v42 }
 0x1ea   :  { %v1227_v41 = vpop.eup %1226 }
 0x1eb   :  { %135 = vrot.lane.b32.xlu1 %v1227_v41, %s1317_s18  ;;  %v1229_v43 = vpop.eup %1228 }
 0x1ec   :  { %v116_v44 = vadd.f32 1.0, %v1229_v43 }
 0x1ee   :  { %1230 = vrcp.f32 %v116_v44 }
 0x1ef   :  { %144 = vrot.lane.b32.xlu1 %v132_v40, %s1317_s18 }
 0x1f8   :  { %v1231_v45 = vpop.eup %1230 }
 0x25d   :  { %v136_v46 = vpop.permute.xlu1 %135 }
 0x25e   :  { %v138_v48 = vmul.f32 %v1231_v45, %v136_v46 }
 0x260   :  { %v140_v49 = vmul.f32 %v139_v47, %v138_v48 }
 0x261   :  { %v145_v50 = vpop.permute.xlu1 %144 }
 0x262   :  { %141 = vst.msk [vmem:[%s1627_s3] sm:$0xff] %vm32_vm0, %v140_v49  ;;  %v147_v51 = vmul.f32 %v145_v50, %v139_v47  ;;  %1043 = vmatmul.mubr.msk.f32.vlgmr.msra.gmra.mrb[0].mxu1 %vm32_vm0, %v140_v49 }
 0x263   :  { %1141 = vmatpush1.bf16.msra.mxu1 %v1360_v8  ;;  %475 = vmatprep.mubr.f32.mxu1 %v1316_v3 }
 0x264   :  { %242 = vrot.lane.b32.xlu1 %v147_v51, %s1317_s18  ;;  %1143 = vmatprep.subr.bf16.mxu1 %v1362_v9 }
 0x267   :  { %1145 = vmatpush1.bf16.msra.mxu1 %v1379_v14 }
 0x268   :  { %1147 = vmatprep.subr.bf16.mxu1 %v1383_v15 }
 0x26b   :  { %1149 = vmatpush1.bf16.msra.mxu1 %v1399_v20 }
 0x26c   :  { %1151 = vmatprep.subr.bf16.mxu1 %v1403_v21 }
 0x26f   :  { %1153 = vmatpush1.bf16.msra.mxu1 %v1413_v24 }
 0x270   :  { %1171 = vmatprep.subr.bf16.mxu1 %v1349_v4 }
 0x2d6   :  { %v243_v1 = vpop.permute.xlu1 %242 }
 0x335   :  { %v221_v53 = vpop.f32.mrb[0].mxu1 }
 0x336   :  { %v223_v54 = vpop.f32.mrb[1].mxu1  ;;  %v226_v58 = vadd.f32 %v1041_v57, %v221_v53 }
 0x337   :  { %v227_v55 = vadd.f32 %v1042_v52, %v223_v54  ;;  %v1053_v52 = vld [vmem:[%s1626_s2 + $0x10] sm:$0xff] }
 0x338   :  { %v1044_v59 = vmul.f32 -1.442695, %v226_v58 }
 0x339   :  { %1232 = vtanh.f32 %v227_v55  ;;  %v1045_v11 = vmul.f32 -1.442695, %v227_v55 }
 0x33a   :  { %1234 = vpow2.f32 %v1044_v59 }
 0x343   :  { %v1233_v56 = vpop.eup %1232 }
 0x344   :  { %247 = vrot.lane.b32.xlu0 %v1233_v56, %s1317_s18  ;;  %v1235_v60 = vpop.eup %1234 }
 0x345   :  { %v234_v61 = vadd.f32 1.0, %v1235_v60 }
 0x347   :  { %1236 = vrcp.f32 %v234_v61 }
 0x351   :  { %v1237_v62 = vpop.eup %1236 }
 0x352   :  { %v245_v2 = vmul.f32 %v1237_v62, %v243_v1 }
 0x3b6   :  { %v248_v63 = vpop.permute.xlu0 %247 }
 0x3b7   :  { %v250_v0 = vmul.f32 %v1237_v62, %v248_v63  ;;  %v1056_v63 = vld [vmem:[%s1625_s0 + $0x38] sm:$0xff] }
 0x3b9   :  { %252 = vrot.lane.b32.xlu0 %v250_v0, %s1317_s18 }
 0x42b   :  { %v253_v5 = vpop.permute.xlu0 %252 }
 0x42c   :  { %v255_v6 = vadd.f32 %v253_v5, %v245_v2 }
 0x42e   :  { %1238 = vtanh.f32 %v255_v6  ;;  %v270_v7 = vsub.f32 %v255_v6, %v243_v1  ;;  %v1055_v6 = vld [vmem:[%s1625_s0 + $0x30] sm:$0xff] }
 0x42f   :  { %1240 = vpow2.f32 %v1045_v11 }
 0x430   :  { %272 = vrot.lane.b32.xlu0 %v270_v7, %s1317_s18 }
 0x438   :  { %v1239_v10 = vpop.eup %1238 }
 0x439   :  { %258 = vrot.lane.b32.xlu1 %v1239_v10, %s1317_s18  ;;  %v1241_v12 = vpop.eup %1240 }
 0x43a   :  { %v235_v13 = vadd.f32 1.0, %v1241_v12 }
 0x43c   :  { %1242 = vrcp.f32 %v235_v13 }
 0x446   :  { %v1243_v22 = vpop.eup %1242 }
 0x4a2   :  { %v273_v17 = vpop.permute.xlu0 %272 }
 0x4a3   :  { %v275_v18 = vmul.f32 %v1046_v16, %v273_v17 }
 0x4a5   :  { %v276_v19 = vadd.f32 %v275_v18, %v147_v51 }
 0x4a7   :  { %370 = vrot.lane.b32.xlu0 %v276_v19, %s1317_s18 }
 0x4ab   :  { %v259_v23 = vpop.permute.xlu1 %258 }
 0x4ac   :  { %v261_v25 = vmul.f32 %v1243_v22, %v259_v23 }
 0x4ae   :  { %v264_v26 = vmul.f32 %v1046_v16, %v261_v25  ;;  %v267_v27 = vsub.f32 %v261_v25, %v140_v49 }
 0x4b0   :  { %1047 = vst.msk [vmem:[%s1627_s3 + $0x8] sm:$0xff] %vm32_vm0, %v264_v26  ;;  %v268_v28 = vmul.f32 %v1046_v16, %v267_v27 }
 0x4b2   :  { %v269_v29 = vadd.f32 %v268_v28, %v140_v49 }
 0x4b4   :  { %1050 = vmatmul.mubr.msk.f32.vlgmr.msra.gmra.mrb[2].mxu0 %vm32_vm0, %v269_v29 }
 0x4b5   :  { %1157 = vmatpush1.bf16.msra.mxu0 %v1360_v8  ;;  %603 = vmatprep.mubr.f32.mxu0 %v1316_v3 }
 0x4b6   :  { %1159 = vmatprep.subr.bf16.mxu0 %v1362_v9 }
 0x4b9   :  { %1161 = vmatpush1.bf16.msra.mxu0 %v1379_v14 }
 0x4ba   :  { %1163 = vmatprep.subr.bf16.mxu0 %v1383_v15 }
 0x4bd   :  { %1165 = vmatpush1.bf16.msra.mxu0 %v1399_v20 }
 0x4be   :  { %1167 = vmatprep.subr.bf16.mxu0 %v1403_v21 }
 0x4c1   :  { %1169 = vmatpush1.bf16.msra.mxu0 %v1413_v24 }
 0x4c2   :  { %1187 = vmatprep.subr.bf16.mxu0 %v1349_v4 }
 0x519   :  { %v371_v43 = vpop.permute.xlu0 %370 }
 0x587   :  { %v349_v31 = vpop.f32.mrb[2].mxu0 }
 0x588   :  { %v351_v32 = vpop.f32.mrb[3].mxu0  ;;  %v354_v36 = vadd.f32 %v1048_v35, %v349_v31 }
 0x589   :  { %v355_v33 = vadd.f32 %v1049_v30, %v351_v32 }
 0x58a   :  { %v1051_v37 = vmul.f32 -1.442695, %v354_v36 }
 0x58b   :  { %1244 = vtanh.f32 %v355_v33  ;;  %v1052_v49 = vmul.f32 -1.442695, %v355_v33 }
 0x58c   :  { %1246 = vpow2.f32 %v1051_v37 }
 0x595   :  { %v1245_v34 = vpop.eup %1244 }
 0x596   :  { %375 = vrot.lane.b32.xlu1 %v1245_v34, %s1317_s18  ;;  %v1247_v38 = vpop.eup %1246 }
 0x597   :  { %v362_v39 = vadd.f32 1.0, %v1247_v38 }
 0x599   :  { %1248 = vrcp.f32 %v362_v39 }
 0x5a3   :  { %v1249_v40 = vpop.eup %1248 }
 0x5a4   :  { %v373_v44 = vmul.f32 %v1249_v40, %v371_v43 }
 0x608   :  { %v376_v41 = vpop.permute.xlu1 %375 }
 0x609   :  { %v378_v42 = vmul.f32 %v1249_v40, %v376_v41  ;;  %v1063_v40 = vld [vmem:[%s1625_s0 + $0x48] sm:$0xff] }
 0x60b   :  { %380 = vrot.lane.b32.xlu1 %v378_v42, %s1317_s18 }
 0x67d   :  { %v381_v45 = vpop.permute.xlu1 %380 }
 0x67e   :  { %v383_v46 = vadd.f32 %v381_v45, %v373_v44  ;;  %v1062_v45 = vld [vmem:[%s1625_s0 + $0x40] sm:$0xff] }
 0x680   :  { %1250 = vtanh.f32 %v383_v46  ;;  %v398_v47 = vsub.f32 %v383_v46, %v371_v43 }
 0x681   :  { %1252 = vpow2.f32 %v1052_v49 }
 0x682   :  { %400 = vrot.lane.b32.xlu1 %v398_v47, %s1317_s18 }
 0x68a   :  { %v1251_v48 = vpop.eup %1250 }
 0x68b   :  { %386 = vrot.lane.b32.xlu0 %v1251_v48, %s1317_s18  ;;  %v1253_v50 = vpop.eup %1252 }
 0x68c   :  { %v363_v51 = vadd.f32 1.0, %v1253_v50 }
 0x68e   :  { %1254 = vrcp.f32 %v363_v51 }
 0x698   :  { %v1255_v56 = vpop.eup %1254 }
 0x6f4   :  { %v401_v53 = vpop.permute.xlu1 %400 }
 0x6f5   :  { %v403_v54 = vmul.f32 %v1053_v52, %v401_v53 }
 0x6f7   :  { %v404_v55 = vadd.f32 %v403_v54, %v276_v19 }
 0x6f9   :  { %498 = vrot.lane.b32.xlu1 %v404_v55, %s1317_s18 }
 0x6fd   :  { %v387_v57 = vpop.permute.xlu0 %386 }
 0x6fe   :  { %v389_v58 = vmul.f32 %v1255_v56, %v387_v57 }
 0x700   :  { %v392_v59 = vmul.f32 %v1053_v52, %v389_v58  ;;  %v395_v60 = vsub.f32 %v389_v58, %v269_v29 }
 0x702   :  { %1054 = vst.msk [vmem:[%s1627_s3 + $0x10] sm:$0xff] %vm32_vm0, %v392_v59  ;;  %v396_v61 = vmul.f32 %v1053_v52, %v395_v60 }
 0x704   :  { %v397_v62 = vadd.f32 %v396_v61, %v269_v29  ;;  %v1060_v29 = vld [vmem:[%s1626_s2 + $0x18] sm:$0xff] }
 0x706   :  { %1057 = vmatmul.mubr.msk.f32.vlgmr.msra.gmra.mrb[2].mxu1 %vm32_vm0, %v397_v62 }
 0x707   :  { %1173 = vmatpush1.bf16.msra.mxu1 %v1360_v8  ;;  %731 = vmatprep.mubr.f32.mxu1 %v1316_v3 }
 0x708   :  { %1175 = vmatprep.subr.bf16.mxu1 %v1362_v9 }
 0x70b   :  { %1177 = vmatpush1.bf16.msra.mxu1 %v1379_v14 }
 0x70c   :  { %1179 = vmatprep.subr.bf16.mxu1 %v1383_v15 }
 0x70f   :  { %1181 = vmatpush1.bf16.msra.mxu1 %v1399_v20 }
 0x710   :  { %1183 = vmatprep.subr.bf16.mxu1 %v1403_v21 }
 0x713   :  { %1185 = vmatpush1.bf16.msra.mxu1 %v1413_v24 }
 0x714   :  { %1203 = vmatprep.subr.bf16.mxu1 %v1349_v4 }
 0x76b   :  { %v499_v17 = vpop.permute.xlu1 %498 }
 0x7d9   :  { %v477_v0 = vpop.f32.mrb[2].mxu1 }
 0x7da   :  { %v479_v1 = vpop.f32.mrb[3].mxu1  ;;  %v482_v7 = vadd.f32 %v1055_v6, %v477_v0 }
 0x7db   :  { %v483_v2 = vadd.f32 %v1056_v63, %v479_v1 }
 0x7dc   :  { %v1058_v10 = vmul.f32 -1.442695, %v482_v7 }
 0x7dd   :  { %1256 = vtanh.f32 %v483_v2  ;;  %v1059_v26 = vmul.f32 -1.442695, %v483_v2 }
 0x7de   :  { %1258 = vpow2.f32 %v1058_v10 }
 0x7e7   :  { %v1257_v5 = vpop.eup %1256 }
 0x7e8   :  { %503 = vrot.lane.b32.xlu0 %v1257_v5, %s1317_s18  ;;  %v1259_v11 = vpop.eup %1258 }
 0x7e9   :  { %v490_v4 = vadd.f32 1.0, %v1259_v11 }
 0x7eb   :  { %1260 = vrcp.f32 %v490_v4 }
 0x7f5   :  { %v1261_v12 = vpop.eup %1260 }
 0x7f6   :  { %v501_v18 = vmul.f32 %v1261_v12, %v499_v17 }
 0x85a   :  { %v504_v13 = vpop.permute.xlu0 %503 }
 0x85b   :  { %v506_v16 = vmul.f32 %v1261_v12, %v504_v13  ;;  %v1070_v12 = vld [vmem:[%s1625_s0 + $0x58] sm:$0xff] }
 0x85d   :  { %508 = vrot.lane.b32.xlu0 %v506_v16, %s1317_s18 }
 0x8cf   :  { %v509_v19 = vpop.permute.xlu0 %508 }
 0x8d0   :  { %v511_v22 = vadd.f32 %v509_v19, %v501_v18 }
 0x8d2   :  { %1262 = vtanh.f32 %v511_v22  ;;  %v526_v23 = vsub.f32 %v511_v22, %v499_v17 }
 0x8d3   :  { %1264 = vpow2.f32 %v1059_v26 }
 0x8d4   :  { %528 = vrot.lane.b32.xlu0 %v526_v23, %s1317_s18 }
 0x8dc   :  { %v1263_v25 = vpop.eup %1262 }
 0x8dd   :  { %514 = vrot.lane.b32.xlu1 %v1263_v25, %s1317_s18  ;;  %v1265_v27 = vpop.eup %1264 }
 0x8de   :  { %v491_v28 = vadd.f32 1.0, %v1265_v27 }
 0x8e0   :  { %1266 = vrcp.f32 %v491_v28 }
 0x8ea   :  { %v1267_v33 = vpop.eup %1266 }
 0x946   :  { %v529_v30 = vpop.permute.xlu0 %528 }
 0x947   :  { %v531_v31 = vmul.f32 %v1060_v29, %v529_v30 }
 0x949   :  { %v532_v32 = vadd.f32 %v531_v31, %v404_v55  ;;  %v1074_v31 = vld [vmem:[%s1626_s2 + $0x28] sm:$0xff] }
 0x94b   :  { %626 = vrot.lane.b32.xlu0 %v532_v32, %s1317_s18 }
 0x94f   :  { %v515_v34 = vpop.permute.xlu1 %514 }
 0x950   :  { %v517_v35 = vmul.f32 %v1267_v33, %v515_v34 }
 0x952   :  { %v520_v36 = vmul.f32 %v1060_v29, %v517_v35  ;;  %v523_v37 = vsub.f32 %v517_v35, %v397_v62 }
 0x954   :  { %1061 = vst.msk [vmem:[%s1627_s3 + $0x18] sm:$0xff] %vm32_vm0, %v520_v36  ;;  %v524_v38 = vmul.f32 %v1060_v29, %v523_v37 }
 0x956   :  { %v525_v39 = vadd.f32 %v524_v38, %v397_v62  ;;  %v1067_v62 = vld [vmem:[%s1626_s2 + $0x20] sm:$0xff] }
 0x958   :  { %1064 = vmatmul.mubr.msk.f32.vlgmr.msra.gmra.mrb[4].mxu0 %vm32_vm0, %v525_v39 }
 0x959   :  { %1189 = vmatpush1.bf16.msra.mxu0 %v1360_v8  ;;  %859 = vmatprep.mubr.f32.mxu0 %v1316_v3 }
 0x95a   :  { %1191 = vmatprep.subr.bf16.mxu0 %v1362_v9 }
 0x95d   :  { %1193 = vmatpush1.bf16.msra.mxu0 %v1379_v14 }
 0x95e   :  { %1195 = vmatprep.subr.bf16.mxu0 %v1383_v15 }
 0x961   :  { %1197 = vmatpush1.bf16.msra.mxu0 %v1399_v20 }
 0x962   :  { %1199 = vmatprep.subr.bf16.mxu0 %v1403_v21 }
 0x965   :  { %1201 = vmatpush1.bf16.msra.mxu0 %v1413_v24 }
 0x9bd   :  { %v627_v53 = vpop.permute.xlu0 %626 }
 0xa2b   :  { %v605_v41 = vpop.f32.mrb[4].mxu0 }
 0xa2c   :  { %v607_v42 = vpop.f32.mrb[5].mxu0  ;;  %v610_v46 = vadd.f32 %v1062_v45, %v605_v41 }
 0xa2d   :  { %v611_v43 = vadd.f32 %v1063_v40, %v607_v42  ;;  %v1077_v42 = vld [vmem:[%s1625_s0 + $0x68] sm:$0xff] }
 0xa2e   :  { %v1065_v47 = vmul.f32 -1.442695, %v610_v46 }
 0xa2f   :  { %1268 = vtanh.f32 %v611_v43  ;;  %v1066_v59 = vmul.f32 -1.442695, %v611_v43 }
 0xa30   :  { %1270 = vpow2.f32 %v1065_v47  ;;  %v1076_v47 = vld [vmem:[%s1625_s0 + $0x60] sm:$0xff] }
 0xa39   :  { %v1269_v44 = vpop.eup %1268 }
 0xa3a   :  { %631 = vrot.lane.b32.xlu1 %v1269_v44, %s1317_s18  ;;  %v1271_v48 = vpop.eup %1270 }
 0xa3b   :  { %v618_v49 = vadd.f32 1.0, %v1271_v48 }
 0xa3d   :  { %1272 = vrcp.f32 %v618_v49 }
 0xa47   :  { %v1273_v50 = vpop.eup %1272 }
 0xa48   :  { %v629_v54 = vmul.f32 %v1273_v50, %v627_v53 }
 0xaac   :  { %v632_v51 = vpop.permute.xlu1 %631 }
 0xaad   :  { %v634_v52 = vmul.f32 %v1273_v50, %v632_v51 }
 0xaaf   :  { %636 = vrot.lane.b32.xlu1 %v634_v52, %s1317_s18 }
 0xb21   :  { %v637_v55 = vpop.permute.xlu1 %636 }
 0xb22   :  { %v639_v56 = vadd.f32 %v637_v55, %v629_v54 }
 0xb24   :  { %1274 = vtanh.f32 %v639_v56  ;;  %v654_v57 = vsub.f32 %v639_v56, %v627_v53 }
 0xb25   :  { %1276 = vpow2.f32 %v1066_v59 }
 0xb26   :  { %656 = vrot.lane.b32.xlu1 %v654_v57, %s1317_s18 }
 0xb2e   :  { %v1275_v58 = vpop.eup %1274 }
 0xb2f   :  { %642 = vrot.lane.b32.xlu0 %v1275_v58, %s1317_s18  ;;  %v1277_v60 = vpop.eup %1276 }
 0xb30   :  { %v619_v61 = vadd.f32 1.0, %v1277_v60 }
 0xb32   :  { %1278 = vrcp.f32 %v619_v61 }
 0xb3c   :  { %v1279_v2 = vpop.eup %1278 }
 0xb98   :  { %v657_v63 = vpop.permute.xlu1 %656 }
 0xb99   :  { %v659_v0 = vmul.f32 %v1067_v62, %v657_v63 }
 0xb9b   :  { %v660_v1 = vadd.f32 %v659_v0, %v532_v32  ;;  %v1081_v0 = vld [vmem:[%s1626_s2 + $0x30] sm:$0xff] }
 0xb9d   :  { %754 = vrot.lane.b32.xlu1 %v660_v1, %s1317_s18 }
 0xba1   :  { %v643_v5 = vpop.permute.xlu0 %642 }
 0xba2   :  { %v645_v6 = vmul.f32 %v1279_v2, %v643_v5 }
 0xba4   :  { %v648_v7 = vmul.f32 %v1067_v62, %v645_v6  ;;  %v651_v10 = vsub.f32 %v645_v6, %v525_v39 }
 0xba6   :  { %1068 = vst.msk [vmem:[%s1627_s3 + $0x20] sm:$0xff] %vm32_vm0, %v648_v7  ;;  %v652_v11 = vmul.f32 %v1067_v62, %v651_v10 }
 0xba8   :  { %v653_v4 = vadd.f32 %v652_v11, %v525_v39 }
 0xbaa   :  { %1071 = vmatmul.mubr.msk.f32.vlgmr.msra.gmra.mrb[4].mxu1 %vm32_vm0, %v653_v4 }
 0xbab   :  { %1205 = vmatpush1.bf16.msra.mxu1 %v1360_v8  ;;  %987 = vmatprep.mubr.f32.mxu1 %v1316_v3 }
 0xbac   :  { %1207 = vmatprep.subr.bf16.mxu1 %v1362_v9  ;;  %v1069_v9 = vld [vmem:[%s1625_s0 + $0x50] sm:$0xff] }
 0xbaf   :  { %1209 = vmatpush1.bf16.msra.mxu1 %v1379_v14 }
 0xbb0   :  { %1211 = vmatprep.subr.bf16.mxu1 %v1383_v15 }
 0xbb3   :  { %1213 = vmatpush1.bf16.msra.mxu1 %v1399_v20 }
 0xbb4   :  { %1215 = vmatprep.subr.bf16.mxu1 %v1403_v21 }
 0xbb7   :  { %1217 = vmatpush1.bf16.msra.mxu1 %v1413_v24 }
 0xc0f   :  { %v755_v19 = vpop.permute.xlu1 %754 }
 0xc7d   :  { %v733_v13 = vpop.f32.mrb[4].mxu1 }
 0xc7e   :  { %v735_v8 = vpop.f32.mrb[5].mxu1  ;;  %v738_v14 = vadd.f32 %v1069_v9, %v733_v13 }
 0xc7f   :  { %v739_v16 = vadd.f32 %v1070_v12, %v735_v8  ;;  %v1084_v8 = vld [vmem:[%s1625_s0 + $0x78] sm:$0xff] }
 0xc80   :  { %v1072_v15 = vmul.f32 -1.442695, %v738_v14 }
 0xc81   :  { %1280 = vtanh.f32 %v739_v16  ;;  %v1073_v28 = vmul.f32 -1.442695, %v739_v16 }
 0xc82   :  { %1282 = vpow2.f32 %v1072_v15  ;;  %v1083_v15 = vld [vmem:[%s1625_s0 + $0x70] sm:$0xff] }
 0xc8b   :  { %v1281_v3 = vpop.eup %1280 }
 0xc8c   :  { %759 = vrot.lane.b32.xlu0 %v1281_v3, %s1317_s18  ;;  %v1283_v20 = vpop.eup %1282 }
 0xc8d   :  { %v746_v21 = vadd.f32 1.0, %v1283_v20 }
 0xc8f   :  { %1284 = vrcp.f32 %v746_v21 }
 0xc99   :  { %v1285_v24 = vpop.eup %1284 }
 0xc9a   :  { %v757_v22 = vmul.f32 %v1285_v24, %v755_v19 }
 0xcfe   :  { %v760_v17 = vpop.permute.xlu0 %759 }
 0xcff   :  { %v762_v18 = vmul.f32 %v1285_v24, %v760_v17 }
 0xd01   :  { %764 = vrot.lane.b32.xlu0 %v762_v18, %s1317_s18 }
 0xd73   :  { %v765_v23 = vpop.permute.xlu0 %764 }
 0xd74   :  { %v767_v25 = vadd.f32 %v765_v23, %v757_v22 }
 0xd76   :  { %1286 = vtanh.f32 %v767_v25  ;;  %v782_v26 = vsub.f32 %v767_v25, %v755_v19 }
 0xd77   :  { %1288 = vpow2.f32 %v1073_v28 }
 0xd78   :  { %784 = vrot.lane.b32.xlu0 %v782_v26, %s1317_s18 }
 0xd80   :  { %v1287_v27 = vpop.eup %1286 }
 0xd81   :  { %770 = vrot.lane.b32.xlu1 %v1287_v27, %s1317_s18  ;;  %v1289_v29 = vpop.eup %1288 }
 0xd82   :  { %v747_v30 = vadd.f32 1.0, %v1289_v29 }
 0xd84   :  { %1290 = vrcp.f32 %v747_v30 }
 0xd8e   :  { %v1291_v35 = vpop.eup %1290 }
 0xdea   :  { %v785_v32 = vpop.permute.xlu0 %784 }
 0xdeb   :  { %v787_v33 = vmul.f32 %v1074_v31, %v785_v32 }
 0xded   :  { %v788_v34 = vadd.f32 %v787_v33, %v660_v1  ;;  %v1088_v33 = vld [vmem:[%s1626_s2 + $0x38] sm:$0xff] }
 0xdef   :  { %882 = vrot.lane.b32.xlu0 %v788_v34, %s1317_s18 }
 0xdf3   :  { %v771_v36 = vpop.permute.xlu1 %770 }
 0xdf4   :  { %v773_v37 = vmul.f32 %v1291_v35, %v771_v36 }
 0xdf6   :  { %v776_v38 = vmul.f32 %v1074_v31, %v773_v37  ;;  %v779_v39 = vsub.f32 %v773_v37, %v653_v4 }
 0xdf8   :  { %1075 = vst.msk [vmem:[%s1627_s3 + $0x28] sm:$0xff] %vm32_vm0, %v776_v38  ;;  %v780_v40 = vmul.f32 %v1074_v31, %v779_v39 }
 0xdfa   :  { %v781_v41 = vadd.f32 %v780_v40, %v653_v4 }
 0xdfc   :  { %1078 = vmatmul.mubr.msk.f32.vlgmr.msra.gmra.mrb[6].mxu0 %vm32_vm0, %v781_v41 }
 0xe61   :  { %v883_v55 = vpop.permute.xlu0 %882 }
 0xecf   :  { %v861_v43 = vpop.f32.mrb[6].mxu0 }
 0xed0   :  { %v863_v44 = vpop.f32.mrb[7].mxu0  ;;  %v866_v48 = vadd.f32 %v1076_v47, %v861_v43 }
 0xed1   :  { %v867_v45 = vadd.f32 %v1077_v42, %v863_v44 }
 0xed2   :  { %v1079_v49 = vmul.f32 -1.442695, %v866_v48 }
 0xed3   :  { %1292 = vtanh.f32 %v867_v45  ;;  %v1080_v61 = vmul.f32 -1.442695, %v867_v45 }
 0xed4   :  { %1294 = vpow2.f32 %v1079_v49 }
 0xedd   :  { %v1293_v46 = vpop.eup %1292 }
 0xede   :  { %887 = vrot.lane.b32.xlu1 %v1293_v46, %s1317_s18  ;;  %v1295_v50 = vpop.eup %1294 }
 0xedf   :  { %v874_v51 = vadd.f32 1.0, %v1295_v50 }
 0xee1   :  { %1296 = vrcp.f32 %v874_v51 }
 0xeeb   :  { %v1297_v52 = vpop.eup %1296 }
 0xeec   :  { %v885_v56 = vmul.f32 %v1297_v52, %v883_v55 }
 0xf50   :  { %v888_v53 = vpop.permute.xlu1 %887 }
 0xf51   :  { %v890_v54 = vmul.f32 %v1297_v52, %v888_v53 }
 0xf53   :  { %892 = vrot.lane.b32.xlu1 %v890_v54, %s1317_s18 }
 0xfc5   :  { %v893_v57 = vpop.permute.xlu1 %892 }
 0xfc6   :  { %v895_v58 = vadd.f32 %v893_v57, %v885_v56 }
 0xfc8   :  { %1298 = vtanh.f32 %v895_v58  ;;  %v910_v59 = vsub.f32 %v895_v58, %v883_v55 }
 0xfc9   :  { %1300 = vpow2.f32 %v1080_v61 }
 0xfca   :  { %912 = vrot.lane.b32.xlu1 %v910_v59, %s1317_s18 }
 0xfd2   :  { %v1299_v60 = vpop.eup %1298 }
 0xfd3   :  { %898 = vrot.lane.b32.xlu0 %v1299_v60, %s1317_s18  ;;  %v1301_v62 = vpop.eup %1300 }
 0xfd4   :  { %v875_v63 = vadd.f32 1.0, %v1301_v62 }
 0xfd6   :  { %1302 = vrcp.f32 %v875_v63 }
 0xfe0   :  { %v1303_v6 = vpop.eup %1302 }
0x103c   :  { %v913_v1 = vpop.permute.xlu1 %912 }
0x103d   :  { %v915_v2 = vmul.f32 %v1081_v0, %v913_v1 }
0x103f   :  { %v916_v5 = vadd.f32 %v915_v2, %v788_v34 }
0x1041   :  { %1010 = vrot.lane.b32.xlu1 %v916_v5, %s1317_s18 }
0x1045   :  { %v899_v7 = vpop.permute.xlu0 %898 }
0x1046   :  { %v901_v10 = vmul.f32 %v1303_v6, %v899_v7 }
0x1048   :  { %v904_v11 = vmul.f32 %v1081_v0, %v901_v10  ;;  %v907_v4 = vsub.f32 %v901_v10, %v781_v41 }
0x104a   :  { %1082 = vst.msk [vmem:[%s1627_s3 + $0x30] sm:$0xff] %vm32_vm0, %v904_v11  ;;  %v908_v12 = vmul.f32 %v1081_v0, %v907_v4 }
0x104c   :  { %v909_v13 = vadd.f32 %v908_v12, %v781_v41 }
0x104e   :  { %1085 = vmatmul.mubr.msk.f32.vlgmr.msra.gmra.mrb[6].mxu1 %vm32_vm0, %v909_v13 }
0x10b3   :  { %v1011_v23 = vpop.permute.xlu1 %1010 }
0x1121   :  { %v989_v16 = vpop.f32.mrb[6].mxu1 }
0x1122   :  { %v991_v3 = vpop.f32.mrb[7].mxu1  ;;  %v994_v20 = vadd.f32 %v1083_v15, %v989_v16 }
0x1123   :  { %v995_v9 = vadd.f32 %v1084_v8, %v991_v3 }
0x1124   :  { %v1086_v21 = vmul.f32 -1.442695, %v994_v20 }
0x1125   :  { %1304 = vtanh.f32 %v995_v9  ;;  %v1087_v29 = vmul.f32 -1.442695, %v995_v9 }
0x1126   :  { %1306 = vpow2.f32 %v1086_v21 }
0x112f   :  { %v1305_v14 = vpop.eup %1304 }
0x1130   :  { %1015 = vrot.lane.b32.xlu0 %v1305_v14, %s1317_s18  ;;  %v1307_v24 = vpop.eup %1306 }
0x1131   :  { %v1002_v17 = vadd.f32 1.0, %v1307_v24 }
0x1133   :  { %1308 = vrcp.f32 %v1002_v17 }
0x113d   :  { %v1309_v18 = vpop.eup %1308 }
0x113e   :  { %v1013_v25 = vmul.f32 %v1309_v18, %v1011_v23 }
0x11a2   :  { %v1016_v19 = vpop.permute.xlu0 %1015 }
0x11a3   :  { %v1018_v22 = vmul.f32 %v1309_v18, %v1016_v19 }
0x11a5   :  { %1020 = vrot.lane.b32.xlu0 %v1018_v22, %s1317_s18 }
0x1217   :  { %v1021_v26 = vpop.permute.xlu0 %1020 }
0x1218   :  { %v1023_v27 = vadd.f32 %v1021_v26, %v1013_v25 }
0x121a   :  { %1310 = vtanh.f32 %v1023_v27 }
0x121b   :  { %1312 = vpow2.f32 %v1087_v29 }
0x1224   :  { %v1311_v28 = vpop.eup %1310 }
0x1225   :  { %1026 = vrot.lane.b32.xlu1 %v1311_v28, %s1317_s18  ;;  %v1313_v30 = vpop.eup %1312 }
0x1226   :  { %v1003_v31 = vadd.f32 1.0, %v1313_v30 }
0x1228   :  { %1314 = vrcp.f32 %v1003_v31 }
0x1232   :  { %v1315_v32 = vpop.eup %1314 }
0x1297   :  { %v1027_v34 = vpop.permute.xlu1 %1026 }
0x1298   :  { %v1029_v35 = vmul.f32 %v1315_v32, %v1027_v34 }
0x129a   :  { %v1032_v36 = vmul.f32 %v1088_v33, %v1029_v35 }
0x129c   :  { %1089 = vst.msk [vmem:[%s1627_s3 + $0x38] sm:$0xff] %vm32_vm0, %v1032_v36 }

</bundles_post_ra>
